<compile_context>
chip_gen: v7x
topology: tpu7x:2x2x1
jax: 0.10.0
libtpu: 0.0.40
codegen_flags: <defaults>
</compile_context>

<pallas_src>
import functools

import jax
import jax.numpy as jnp
from jax import lax
from jax.experimental import pallas as pl
from jax.experimental.pallas import tpu as pltpu


def _default_bf16_elementwise():
    """Use bf16 bias/ReLU only on chips whose VPU has packed bf16 (v6e / v7x)."""
    try:
        kind = jax.devices()[0].device_kind.lower()
    except Exception:
        return False
    return ("v6" in kind) or ("v7" in kind)


def _pick_tile_b(batch, tile_b):
    """Tile must be a multiple of 1024 (layout constraints).  Keep >= 2 grid steps
    when the batch allows it so v7x's two TensorCores both get work; cap at 8192."""
    tb = max(1024, (min(int(tile_b), 8192) // 1024) * 1024)
    while tb > 1024 and pl.cdiv(batch, tb) < 2:
        tb -= 1024
    return tb


def _block_diag(w, n):
    """n copies of w along the diagonal: (i, o) -> (n*i, n*o)."""
    return jnp.kron(jnp.eye(n, dtype=w.dtype), w)


def _classifier_kernel(xp_ref,
                       w1_ref, b1_ref, w2_ref, b2_ref, w3_ref, b3_ref,
                       w4_ref, b4_ref, w5t_ref, b5_ref,
                       o_ref, *, bf16_elem):
    """One batch tile of the packed MLP.

    xp_ref : (rows, N*in)         bf16   N packed batch rows per packed row
    w1_ref : (N*in, N*width)      bf16   block-diagonal
    w2..w4 : (N*width, N*width)   bf16   block-diagonal
    w5t_ref: (N, N*width)         bf16   block-diagonal head weight, pre-transposed
    b1..b4 : (1, N*width)         bf16 (v6e/v7x) or f32 (v5e), tiled
    b5_ref : (1, 1)               f32
    o_ref  : (N, rows)            f32    lane-dense output slab
    """

    def bias_relu(acc_f32, b_ref):
        if bf16_elem:                      # packed-bf16 VALU (v6e / v7x)
            return jnp.maximum(acc_f32.astype(jnp.bfloat16) + b_ref[...], 0.0)
        return jnp.maximum(acc_f32 + b_ref[...], 0.0)     # f32 VALU (v5e)

    # layer 1: (rows, N*in) x (N*in, N*width)  -- one small MXU pass
    h = bias_relu(
        jnp.dot(xp_ref[...], w1_ref[...], preferred_element_type=jnp.float32),
        b1_ref)

    # layers 2-4: 256-wide block-diagonal bf16 MXU passes, f32 accumulation
    for w_ref, b_ref in ((w2_ref, b2_ref), (w3_ref, b3_ref), (w4_ref, b4_ref)):
        lhs = h if bf16_elem else h.astype(jnp.bfloat16)
        h = bias_relu(
            jnp.dot(lhs, w_ref[...], preferred_element_type=jnp.float32),
            b_ref)

    # head, computed transposed: (N, N*width) . (rows, N*width)^T -> (N, rows)
    # (contract-last-dims dot_general == the standard q.k^T MXU pattern)
    lhs = h if bf16_elem else h.astype(jnp.bfloat16)
    out_t = lax.dot_general(w5t_ref[...], lhs,
                            dimension_numbers=(((1,), (1,)), ((), ())),
                            preferred_element_type=jnp.float32)
    o_ref[...] = out_t + b5_ref[...]        # lane-dense unmasked store


@functools.partial(jax.jit, static_argnames=("tile_b", "pack", "bf16_elem"))
def classifier_forward(x, params, *, tile_b=4096, pack=8, bf16_elem=None):
    """params = ((w1,b1), ..., (w5,b5)) with w: [in, out], b: [1, out]. Returns (B, 1)."""
    if bf16_elem is None:
        bf16_elem = _default_bf16_elementwise()

    (w1, b1), (w2, b2), (w3, b3), (w4, b4), (w5, b5) = params
    B, in_features = x.shape
    width = w2.shape[0]
    n = int(pack)
    assert n % 8 == 0, "pack must be a multiple of 8 (output-slab sublane alignment)"

    tile_b_eff = _pick_tile_b(B, tile_b)
    assert tile_b_eff % (n * 128) == 0
    num_tiles = pl.cdiv(B, tile_b_eff)
    padded_b = num_tiles * tile_b_eff
    rows = tile_b_eff // n            # packed rows per tile
    pi = n * in_features              # packed input width
    pw = n * width                    # packed hidden width

    # lane-dense packed input: N consecutive rows per packed row (free row-major view)
    xw = x.astype(jnp.bfloat16)
    if padded_b != B:
        xw = jnp.pad(xw, ((0, padded_b - B), (0, 0)))
    xp = xw.reshape(padded_b // n, pi)

    # block-diagonally packed weights (MXU operands -> bf16)
    w1p = _block_diag(w1, n).astype(jnp.bfloat16)            # (pi, pw)
    w2p = _block_diag(w2, n).astype(jnp.bfloat16)            # (pw, pw)
    w3p = _block_diag(w3, n).astype(jnp.bfloat16)
    w4p = _block_diag(w4, n).astype(jnp.bfloat16)
    w5t = _block_diag(w5.T, n).astype(jnp.bfloat16)          # (n, pw), pre-transposed head
    bias_dtype = jnp.bfloat16 if bf16_elem else jnp.float32
    b1p, b2p, b3p, b4p = (jnp.tile(b, (1, n)).astype(bias_dtype)
                          for b in (b1, b2, b3, b4))
    b5p = b5.astype(jnp.float32)                             # (1, 1)

    resident = lambda i: (0, 0)   # same block every grid step -> stays VMEM-resident

    flops = (padded_b // n) * 2 * (pi * pw + 3 * pw * pw + pw * n)
    bytes_accessed = (int(xp.size) * 2 + padded_b * 4
                      + sum(int(a.size) * a.dtype.itemsize
                            for a in (w1p, b1p, w2p, b2p, w3p, b3p, w4p, b4p, w5t, b5p)))

    out = pl.pallas_call(
        functools.partial(_classifier_kernel, bf16_elem=bf16_elem),
        out_shape=jax.ShapeDtypeStruct((num_tiles * n, rows), jnp.float32),
        grid=(num_tiles,),
        in_specs=[
            pl.BlockSpec((rows, pi), lambda i: (i, 0)),             # packed x tile
            pl.BlockSpec(w1p.shape, resident), pl.BlockSpec(b1p.shape, resident),
            pl.BlockSpec(w2p.shape, resident), pl.BlockSpec(b2p.shape, resident),
            pl.BlockSpec(w3p.shape, resident), pl.BlockSpec(b3p.shape, resident),
            pl.BlockSpec(w4p.shape, resident), pl.BlockSpec(b4p.shape, resident),
            pl.BlockSpec(w5t.shape, resident), pl.BlockSpec(b5p.shape, resident),
        ],
        out_specs=pl.BlockSpec((n, rows), lambda i: (i, 0)),        # lane-dense slab
        compiler_params=pltpu.CompilerParams(
            dimension_semantics=("parallel",),
            vmem_limit_bytes=32 * 1024 * 1024,
        ),
        cost_estimate=pl.CostEstimate(flops=flops, transcendentals=0,
                                      bytes_accessed=bytes_accessed),
    )(xp, w1p, b1p, w2p, b2p, w3p, b3p, w4p, b4p, w5t, b5p)

    # undo packing order: per tile, out[j, r] is the logit of local row r*n + j
    out = out.reshape(num_tiles, n, rows).transpose(0, 2, 1).reshape(-1)[:B]
    return out.reshape(B, 1)


def init_params(key, in_features=2, width=32, nlayer=4):
    """Deterministic init matching torch.nn.Linear shapes (we store W^T: [in, out])."""
    params = []
    fan_in = in_features
    for _ in range(nlayer):
        key, kw, kb = jax.random.split(key, 3)
        bound = 1.0 / jnp.sqrt(fan_in)
        w = jax.random.uniform(kw, (fan_in, width), jnp.float32, -bound, bound)
        b = jax.random.uniform(kb, (1, width), jnp.float32, -bound, bound)
        params.append((w, b))
        fan_in = width
    key, kw, kb = jax.random.split(key, 3)
    bound = 1.0 / jnp.sqrt(fan_in)
    w = jax.random.uniform(kw, (fan_in, 1), jnp.float32, -bound, bound)
    b = jax.random.uniform(kb, (1, 1), jnp.float32, -bound, bound)
    params.append((w, b))
    return tuple(params)


def reference_forward(x, params, *, bf16_elem=False):
    """Pure-JAX reference mirroring the kernel's precision
    (bf16 MXU operands, f32 accumulation; bf16 bias/ReLU when bf16_elem)."""
    (w1, b1), (w2, b2), (w3, b3), (w4, b4), (w5, b5) = params

    def bias_relu(acc, b):
        if bf16_elem:
            return jnp.maximum(acc.astype(jnp.bfloat16) + b.astype(jnp.bfloat16), 0.0)
        return jnp.maximum(acc + b, 0.0)

    h = bias_relu(jnp.dot(x.astype(jnp.bfloat16), w1.astype(jnp.bfloat16),
                          preferred_element_type=jnp.float32), b1)
    for w, b in ((w2, b2), (w3, b3), (w4, b4)):
        lhs = h if bf16_elem else h.astype(jnp.bfloat16)
        h = bias_relu(jnp.dot(lhs, w.astype(jnp.bfloat16),
                              preferred_element_type=jnp.float32), b)
    lhs = h if bf16_elem else h.astype(jnp.bfloat16)
    return jnp.dot(lhs, w5.astype(jnp.bfloat16),
                   preferred_element_type=jnp.float32) + b5


if __name__ == "__main__":
    key = jax.random.PRNGKey(0)
    key, kx = jax.random.split(key)

    batch = 8
    in_features = 2
    width = 32
    nlayer = 4

    x = jax.random.normal(kx, (batch, in_features), dtype=jnp.float32)
    params = init_params(key, in_features=in_features, width=width, nlayer=nlayer)

    bf16_elem = _default_bf16_elementwise()
    out = classifier_forward(x, params, bf16_elem=bf16_elem)
    out = jax.block_until_ready(out)

    ref = reference_forward(x, params, bf16_elem=bf16_elem)
    assert out.shape == (batch, 1), out.shape
    # hidden layers deliberately run bf16 on the MXU; tolerance reflects bf16 rounding
    assert jnp.allclose(out, ref, atol=5e-3, rtol=5e-3), "mismatch vs JAX reference"

    print("KERNEL_OK")
</pallas_src>

<mosaic_0001>
module attributes {stable_mosaic.version = 11 : i64} {
  func.func @_classifier_kernel(%arg0: i32, %arg1: memref<128x16xbf16, #tpu.memory_space<vmem>>, %arg2: memref<16x256xbf16, #tpu.memory_space<vmem>>, %arg3: memref<1x256xf32, #tpu.memory_space<vmem>>, %arg4: memref<256x256xbf16, #tpu.memory_space<vmem>>, %arg5: memref<1x256xf32, #tpu.memory_space<vmem>>, %arg6: memref<256x256xbf16, #tpu.memory_space<vmem>>, %arg7: memref<1x256xf32, #tpu.memory_space<vmem>>, %arg8: memref<256x256xbf16, #tpu.memory_space<vmem>>, %arg9: memref<1x256xf32, #tpu.memory_space<vmem>>, %arg10: memref<8x256xbf16, #tpu.memory_space<vmem>>, %arg11: memref<1x1xf32, #tpu.memory_space<vmem>>, %arg12: memref<8x128xf32, #tpu.memory_space<vmem>>) attributes {dimension_semantics = [#tpu.dimension_semantics<parallel>], iteration_bounds = array<i64: 1>, scalar_prefetch = 0 : i64, scratch_operands = 0 : i64, tpu.core_type = #tpu.core_type<tc>, window_params = [{transform_indices = @transform_0, window_bounds = array<i64: 128, 16>}, {pipeline_mode = #tpu.pipeline_mode<synchronous>, transform_indices = @transform_1, window_bounds = array<i64: 16, 256>}, {pipeline_mode = #tpu.pipeline_mode<synchronous>, transform_indices = @transform_2, window_bounds = array<i64: 1, 256>}, {pipeline_mode = #tpu.pipeline_mode<synchronous>, transform_indices = @transform_3, window_bounds = array<i64: 256, 256>}, {pipeline_mode = #tpu.pipeline_mode<synchronous>, transform_indices = @transform_4, window_bounds = array<i64: 1, 256>}, {pipeline_mode = #tpu.pipeline_mode<synchronous>, transform_indices = @transform_5, window_bounds = array<i64: 256, 256>}, {pipeline_mode = #tpu.pipeline_mode<synchronous>, transform_indices = @transform_6, window_bounds = array<i64: 1, 256>}, {pipeline_mode = #tpu.pipeline_mode<synchronous>, transform_indices = @transform_7, window_bounds = array<i64: 256, 256>}, {pipeline_mode = #tpu.pipeline_mode<synchronous>, transform_indices = @transform_8, window_bounds = array<i64: 1, 256>}, {pipeline_mode = #tpu.pipeline_mode<synchronous>, transform_indices = @transform_9, window_bounds = array<i64: 8, 256>}, {pipeline_mode = #tpu.pipeline_mode<synchronous>, transform_indices = @transform_10, window_bounds = array<i64: 1, 1>}, {transform_indices = @transform_11, window_bounds = array<i64: 8, 128>}]} {
    %c0 = arith.constant 0 : index
    %c0_0 = arith.constant 0 : index
    %0 = vector.load %arg1[%c0, %c0_0] : memref<128x16xbf16, #tpu.memory_space<vmem>>, vector<128x16xbf16>
    %c0_1 = arith.constant 0 : index
    %c0_2 = arith.constant 0 : index
    %1 = vector.load %arg2[%c0_1, %c0_2] : memref<16x256xbf16, #tpu.memory_space<vmem>>, vector<16x256xbf16>
    %cst = arith.constant dense<0.000000e+00> : vector<128x256xf32>
    %2 = tpu.matmul %0, %1, %cst {dimension_numbers = #tpu.dot_dimension_numbers<[1], [0], [0], [1], [0, 0, 1, 1], [], []>} : vector<128x16xbf16>, vector<16x256xbf16>, vector<128x256xf32> -> vector<128x256xf32>
    %c0_3 = arith.constant 0 : index
    %c0_4 = arith.constant 0 : index
    %3 = vector.load %arg3[%c0_3, %c0_4] : memref<1x256xf32, #tpu.memory_space<vmem>>, vector<1x256xf32>
    %4 = vector.broadcast %3 : vector<1x256xf32> to vector<128x256xf32>
    %5 = arith.addf %2, %4 : vector<128x256xf32>
    %cst_5 = arith.constant 0.000000e+00 : f32
    %6 = vector.broadcast %cst_5 : f32 to vector<128x256xf32>
    %7 = arith.maximumf %5, %6 : vector<128x256xf32>
    %8 = arith.truncf %7 : vector<128x256xf32> to vector<128x256xbf16>
    %c0_6 = arith.constant 0 : index
    %c0_7 = arith.constant 0 : index
    %9 = vector.load %arg4[%c0_6, %c0_7] : memref<256x256xbf16, #tpu.memory_space<vmem>>, vector<256x256xbf16>
    %cst_8 = arith.constant dense<0.000000e+00> : vector<128x256xf32>
    %10 = tpu.matmul %8, %9, %cst_8 {dimension_numbers = #tpu.dot_dimension_numbers<[1], [0], [0], [1], [0, 0, 1, 1], [], []>} : vector<128x256xbf16>, vector<256x256xbf16>, vector<128x256xf32> -> vector<128x256xf32>
    %c0_9 = arith.constant 0 : index
    %c0_10 = arith.constant 0 : index
    %11 = vector.load %arg5[%c0_9, %c0_10] : memref<1x256xf32, #tpu.memory_space<vmem>>, vector<1x256xf32>
    %12 = vector.broadcast %11 : vector<1x256xf32> to vector<128x256xf32>
    %13 = arith.addf %10, %12 : vector<128x256xf32>
    %cst_11 = arith.constant 0.000000e+00 : f32
    %14 = vector.broadcast %cst_11 : f32 to vector<128x256xf32>
    %15 = arith.maximumf %13, %14 : vector<128x256xf32>
    %16 = arith.truncf %15 : vector<128x256xf32> to vector<128x256xbf16>
    %c0_12 = arith.constant 0 : index
    %c0_13 = arith.constant 0 : index
    %17 = vector.load %arg6[%c0_12, %c0_13] : memref<256x256xbf16, #tpu.memory_space<vmem>>, vector<256x256xbf16>
    %cst_14 = arith.constant dense<0.000000e+00> : vector<128x256xf32>
    %18 = tpu.matmul %16, %17, %cst_14 {dimension_numbers = #tpu.dot_dimension_numbers<[1], [0], [0], [1], [0, 0, 1, 1], [], []>} : vector<128x256xbf16>, vector<256x256xbf16>, vector<128x256xf32> -> vector<128x256xf32>
    %c0_15 = arith.constant 0 : index
    %c0_16 = arith.constant 0 : index
    %19 = vector.load %arg7[%c0_15, %c0_16] : memref<1x256xf32, #tpu.memory_space<vmem>>, vector<1x256xf32>
    %20 = vector.broadcast %19 : vector<1x256xf32> to vector<128x256xf32>
    %21 = arith.addf %18, %20 : vector<128x256xf32>
    %cst_17 = arith.constant 0.000000e+00 : f32
    %22 = vector.broadcast %cst_17 : f32 to vector<128x256xf32>
    %23 = arith.maximumf %21, %22 : vector<128x256xf32>
    %24 = arith.truncf %23 : vector<128x256xf32> to vector<128x256xbf16>
    %c0_18 = arith.constant 0 : index
    %c0_19 = arith.constant 0 : index
    %25 = vector.load %arg8[%c0_18, %c0_19] : memref<256x256xbf16, #tpu.memory_space<vmem>>, vector<256x256xbf16>
    %cst_20 = arith.constant dense<0.000000e+00> : vector<128x256xf32>
    %26 = tpu.matmul %24, %25, %cst_20 {dimension_numbers = #tpu.dot_dimension_numbers<[1], [0], [0], [1], [0, 0, 1, 1], [], []>} : vector<128x256xbf16>, vector<256x256xbf16>, vector<128x256xf32> -> vector<128x256xf32>
    %c0_21 = arith.constant 0 : index
    %c0_22 = arith.constant 0 : index
    %27 = vector.load %arg9[%c0_21, %c0_22] : memref<1x256xf32, #tpu.memory_space<vmem>>, vector<1x256xf32>
    %28 = vector.broadcast %27 : vector<1x256xf32> to vector<128x256xf32>
    %29 = arith.addf %26, %28 : vector<128x256xf32>
    %cst_23 = arith.constant 0.000000e+00 : f32
    %30 = vector.broadcast %cst_23 : f32 to vector<128x256xf32>
    %31 = arith.maximumf %29, %30 : vector<128x256xf32>
    %32 = arith.truncf %31 : vector<128x256xf32> to vector<128x256xbf16>
    %c0_24 = arith.constant 0 : index
    %c0_25 = arith.constant 0 : index
    %33 = vector.load %arg10[%c0_24, %c0_25] : memref<8x256xbf16, #tpu.memory_space<vmem>>, vector<8x256xbf16>
    %cst_26 = arith.constant dense<0.000000e+00> : vector<8x128xf32>
    %34 = tpu.matmul %33, %32, %cst_26 {dimension_numbers = #tpu.dot_dimension_numbers<[1], [1], [0], [0], [0, 0, 1, 0], [], []>} : vector<8x256xbf16>, vector<128x256xbf16>, vector<8x128xf32> -> vector<8x128xf32>
    %c0_27 = arith.constant 0 : index
    %c0_28 = arith.constant 0 : index
    %35 = vector.load %arg11[%c0_27, %c0_28] : memref<1x1xf32, #tpu.memory_space<vmem>>, vector<1x1xf32>
    %36 = vector.broadcast %35 : vector<1x1xf32> to vector<8x128xf32>
    %37 = arith.addf %34, %36 : vector<8x128xf32>
    %c0_29 = arith.constant 0 : index
    %c0_30 = arith.constant 0 : index
    %38 = vector.load %arg12[%c0_29, %c0_30] : memref<8x128xf32, #tpu.memory_space<vmem>>, vector<8x128xf32>
    tpu.vector_store %arg12[%c0_29, %c0_30], %37 {strides = array<i32>} : memref<8x128xf32, #tpu.memory_space<vmem>>, vector<8x128xf32>,
    return
  }
  func.func @transform_0(%arg0: i32) -> (i32, i32) {
    %c0_i32 = arith.constant 0 : i32
    %c0_i32_0 = arith.constant 0 : i32
    return %arg0, %c0_i32 : i32, i32
  }
  func.func @transform_1(%arg0: i32) -> (i32, i32) {
    %c0_i32 = arith.constant 0 : i32
    %c0_i32_0 = arith.constant 0 : i32
    %c0_i32_1 = arith.constant 0 : i32
    return %c0_i32, %c0_i32_0 : i32, i32
  }
  func.func @transform_2(%arg0: i32) -> (i32, i32) {
    %c0_i32 = arith.constant 0 : i32
    %c0_i32_0 = arith.constant 0 : i32
    %c0_i32_1 = arith.constant 0 : i32
    return %c0_i32, %c0_i32_0 : i32, i32
  }
  func.func @transform_3(%arg0: i32) -> (i32, i32) {
    %c0_i32 = arith.constant 0 : i32
    %c0_i32_0 = arith.constant 0 : i32
    %c0_i32_1 = arith.constant 0 : i32
    return %c0_i32, %c0_i32_0 : i32, i32
  }
  func.func @transform_4(%arg0: i32) -> (i32, i32) {
    %c0_i32 = arith.constant 0 : i32
    %c0_i32_0 = arith.constant 0 : i32
    %c0_i32_1 = arith.constant 0 : i32
    return %c0_i32, %c0_i32_0 : i32, i32
  }
  func.func @transform_5(%arg0: i32) -> (i32, i32) {
    %c0_i32 = arith.constant 0 : i32
    %c0_i32_0 = arith.constant 0 : i32
    %c0_i32_1 = arith.constant 0 : i32
    return %c0_i32, %c0_i32_0 : i32, i32
  }
  func.func @transform_6(%arg0: i32) -> (i32, i32) {
    %c0_i32 = arith.constant 0 : i32
    %c0_i32_0 = arith.constant 0 : i32
    %c0_i32_1 = arith.constant 0 : i32
    return %c0_i32, %c0_i32_0 : i32, i32
  }
  func.func @transform_7(%arg0: i32) -> (i32, i32) {
    %c0_i32 = arith.constant 0 : i32
    %c0_i32_0 = arith.constant 0 : i32
    %c0_i32_1 = arith.constant 0 : i32
    return %c0_i32, %c0_i32_0 : i32, i32
  }
  func.func @transform_8(%arg0: i32) -> (i32, i32) {
    %c0_i32 = arith.constant 0 : i32
    %c0_i32_0 = arith.constant 0 : i32
    %c0_i32_1 = arith.constant 0 : i32
    return %c0_i32, %c0_i32_0 : i32, i32
  }
  func.func @transform_9(%arg0: i32) -> (i32, i32) {
    %c0_i32 = arith.constant 0 : i32
    %c0_i32_0 = arith.constant 0 : i32
    %c0_i32_1 = arith.constant 0 : i32
    return %c0_i32, %c0_i32_0 : i32, i32
  }
  func.func @transform_10(%arg0: i32) -> (i32, i32) {
    %c0_i32 = arith.constant 0 : i32
    %c0_i32_0 = arith.constant 0 : i32
    %c0_i32_1 = arith.constant 0 : i32
    return %c0_i32, %c0_i32_0 : i32, i32
  }
  func.func @transform_11(%arg0: i32) -> (i32, i32) {
    %c0_i32 = arith.constant 0 : i32
    %c0_i32_0 = arith.constant 0 : i32
    return %arg0, %c0_i32 : i32, i32
  }
}

</mosaic_0001>

<bundles_post_ra>
// kernel: classifier_forward.1
= control target key start
LH: loop header
LB: loop body
LE: loop exit
PB: predicated region body
PF: predicated region fallthrough
CT: control target
= control target key end

     0   :  { %v1741_v1 = vmov 0   ;;  %vm121_vm0 = vcmask 130048   ;;  %s2320_s1 = inlined_call_operand.vmem [shape: bf16[16,256], index: 1, kind: input, shape index: {}]   ;;  %s2321_s0 = inlined_call_operand.vmem [shape: bf16[128,16], index: 0, kind: input, shape index: {}]   ;;  %s2322_s3 = inlined_call_operand.vmem [shape: bf16[256,256], index: 3, kind: input, shape index: {}]   ;;  %s2323_s5 = inlined_call_operand.vmem [shape: bf16[256,256], index: 5, kind: input, shape index: {}]   ;;  %s2324_s2 = inlined_call_operand.vmem [shape: f32[1,256], index: 2, kind: input, shape index: {}]   ;;  %s2325_s7 = inlined_call_operand.vmem [shape: bf16[256,256], index: 7, kind: input, shape index: {}]   ;;  %s2326_s4 = inlined_call_operand.vmem [shape: f32[1,256], index: 4, kind: input, shape index: {}]   ;;  %s2327_s6 = inlined_call_operand.vmem [shape: f32[1,256], index: 6, kind: input, shape index: {}]   ;;  %s2328_s9 = inlined_call_operand.vmem [shape: bf16[8,256], index: 9, kind: input, shape index: {}]   ;;  %s2329_s10 = inlined_call_operand.<no memory space> [shape: f32[1,1], index: 10, kind: input, shape index: {}]   ;;  %s2330_s8 = inlined_call_operand.vmem [shape: f32[1,256], index: 8, kind: input, shape index: {}]   ;;  %s2331_s11 = inlined_call_operand.vmem [shape: f32[8,128], index: 11, kind: output, shape index: {}]  }
   0x1   :  { %v1584_v0 = vld [vmem:[%s2320_s1 + $0x4] ss:$8 sps:$4 sm:$0xff]   ;;  %178 = vmatprep.mubr.bf16.mxu0 %v1741_v1  ;;  %1583 = vset.pattern.permute.xlu0 %v1741_v1  ;;  %v1586_v2 = vld [vmem:[%s2320_s1] ss:$8 sps:$4 sm:$0xff]   ;;  %v1598_v7 = vld [vmem:[%s2322_s3 + $0x14] ss:$8 sps:$4 sm:$0xff]  }
   0x2   :  { %146 = vmatprep.subr.bf16.mxu0 %v1584_v0  ;;  %v1587_v3 = vld [vmem:[%s2321_s0] sm:$0xff]   ;;  %v1588_v4 = vld [vmem:[%s2321_s0 + $0x8] sm:$0xff]   ;;  %v1600_v8 = vld [vmem:[%s2322_s3 + $0x10] ss:$8 sps:$4 sm:$0xff]  }
   0x3   :  { %147 = vmatpush1.bf16.msra.mxu0 %v1586_v2  ;;  %v1595_v5 = vld [vmem:[%s2322_s3 + $0x4] ss:$8 sps:$4 sm:$0xff]   ;;  %v1597_v6 = vld [vmem:[%s2322_s3] ss:$8 sps:$4 sm:$0xff]   ;;  %v1589_v11 = vld [vmem:[%s2321_s0 + $0x10] sm:$0xff]  }
   0x4   :  { %511 = vmatprep.subr.bf16.mxu1 %v1595_v5  ;;  %v1601_v9 = vld [vmem:[%s2322_s3 + $0x24] ss:$8 sps:$4 sm:$0xff]   ;;  %v1603_v10 = vld [vmem:[%s2322_s3 + $0x20] ss:$8 sps:$4 sm:$0xff]   ;;  %v1604_v12 = vld [vmem:[%s2322_s3 + $0x34] ss:$8 sps:$4 sm:$0xff]  }
   0x5   :  { %512 = vmatpush1.bf16.msra.mxu1 %v1597_v6  ;;  %v1606_v13 = vld [vmem:[%s2322_s3 + $0x30] ss:$8 sps:$4 sm:$0xff]   ;;  %v1607_v14 = vld [vmem:[%s2322_s3 + $0x44] ss:$8 sps:$4 sm:$0xff]   ;;  %v1609_v15 = vld [vmem:[%s2322_s3 + $0x40] ss:$8 sps:$4 sm:$0xff]  }
   0x6   :  { %1475 = vmatmul.mubr.msk.bf16.vlgmr.msra.gmra.mrb[0].mxu0 %vm121_vm0, %v1587_v3  ;;  %513 = vmatprep.subr.bf16.mxu1 %v1598_v7  ;;  %v1590_v16 = vld [vmem:[%s2321_s0 + $0x18] sm:$0xff]   ;;  %v1613_v19 = vld [vmem:[%s2322_s3 + $0x64] ss:$8 sps:$4 sm:$0xff]   ;;  %v1615_v20 = vld [vmem:[%s2322_s3 + $0x60] ss:$8 sps:$4 sm:$0xff]   ;;  %v61_v3 = vlaneseq }
   0x7   :  { %188 = vmatprep.mubr.bf16.mxu0 %v1741_v1  ;;  %v1610_v17 = vld [vmem:[%s2322_s3 + $0x54] ss:$8 sps:$4 sm:$0xff]   ;;  %v1612_v18 = vld [vmem:[%s2322_s3 + $0x50] ss:$8 sps:$4 sm:$0xff]   ;;  %v1591_v21 = vld [vmem:[%s2321_s0 + $0x20] sm:$0xff]  }
   0x8   :  { %v1616_v22 = vld [vmem:[%s2322_s3 + $0x74] ss:$8 sps:$4 sm:$0xff]   ;;  %v1618_v23 = vld [vmem:[%s2322_s3 + $0x70] ss:$8 sps:$4 sm:$0xff]   ;;  %v1619_v24 = vld [vmem:[%s2322_s3 + $0x84] ss:$8 sps:$4 sm:$0xff]  }
   0x9   :  { %514 = vmatpush1.bf16.msra.mxu1 %v1600_v8  ;;  %v1621_v25 = vld [vmem:[%s2322_s3 + $0x80] ss:$8 sps:$4 sm:$0xff]   ;;  %v1622_v27 = vld [vmem:[%s2322_s3 + $0x94] ss:$8 sps:$4 sm:$0xff]   ;;  %v1624_v28 = vld [vmem:[%s2322_s3 + $0x90] ss:$8 sps:$4 sm:$0xff]  }
   0xa   :  { %515 = vmatprep.subr.bf16.mxu1 %v1601_v9  ;;  %v1592_v26 = vld [vmem:[%s2321_s0 + $0x28] sm:$0xff]   ;;  %v1593_v31 = vld [vmem:[%s2321_s0 + $0x30] sm:$0xff]   ;;  %v1594_v36 = vld [vmem:[%s2321_s0 + $0x38] sm:$0xff]   ;;  %v62_v6 = vshrl.u32 %v61_v3, 7 }
   0xb   :  { %v1625_v29 = vld [vmem:[%s2322_s3 + $0xa4] ss:$8 sps:$4 sm:$0xff]   ;;  %v1627_v30 = vld [vmem:[%s2322_s3 + $0xa0] ss:$8 sps:$4 sm:$0xff]   ;;  %v1628_v32 = vld [vmem:[%s2322_s3 + $0xb4] ss:$8 sps:$4 sm:$0xff]  }
   0xc   :  { %v1630_v33 = vld [vmem:[%s2322_s3 + $0xb0] ss:$8 sps:$4 sm:$0xff]   ;;  %v1631_v34 = vld [vmem:[%s2322_s3 + $0xc4] ss:$8 sps:$4 sm:$0xff]   ;;  %v1633_v35 = vld [vmem:[%s2322_s3 + $0xc0] ss:$8 sps:$4 sm:$0xff]  }
   0xd   :  { %516 = vmatpush1.bf16.msra.mxu1 %v1603_v10  ;;  %v1634_v37 = vld [vmem:[%s2322_s3 + $0xd4] ss:$8 sps:$4 sm:$0xff]   ;;  %v1636_v38 = vld [vmem:[%s2322_s3 + $0xd0] ss:$8 sps:$4 sm:$0xff]   ;;  %v1637_v39 = vld [vmem:[%s2322_s3 + $0xe4] ss:$8 sps:$4 sm:$0xff]  }
   0xe   :  { %1476 = vmatmul.mubr.msk.bf16.gmra.mrb[4].mxu0 %vm121_vm0, %v1588_v4  ;;  %517 = vmatprep.subr.bf16.mxu1 %v1604_v12  ;;  %v1639_v40 = vld [vmem:[%s2322_s3 + $0xe0] ss:$8 sps:$4 sm:$0xff]   ;;  %v1640_v41 = vld [vmem:[%s2322_s3 + $0xf4] ss:$8 sps:$4 sm:$0xff]   ;;  %v1642_v42 = vld [vmem:[%s2322_s3 + $0xf0] ss:$8 sps:$4 sm:$0xff]  }
   0xf   :  { %198 = vmatprep.mubr.bf16.mxu0 %v1741_v1  ;;  %v1643_v43 = vld [vmem:[%s2323_s5] ss:$8 sps:$4 sm:$0xff]   ;;  %v1645_v44 = vld [vmem:[%s2323_s5 + $0x4] ss:$8 sps:$4 sm:$0xff]   ;;  %v1648_v45 = vld [vmem:[%s2323_s5 + $0x14] ss:$8 sps:$4 sm:$0xff]  }
  0x10   :  { %876 = vmatprep.subr.bf16.mxu0 %v1645_v44  ;;  %v1646_v46 = vld [vmem:[%s2323_s5 + $0x10] ss:$8 sps:$4 sm:$0xff]   ;;  %v1651_v47 = vld [vmem:[%s2323_s5 + $0x24] ss:$8 sps:$4 sm:$0xff]   ;;  %v1649_v48 = vld [vmem:[%s2323_s5 + $0x20] ss:$8 sps:$4 sm:$0xff]  }
  0x11   :  { %518 = vmatpush1.bf16.msra.mxu1 %v1606_v13  ;;  %877 = vmatpush1.bf16.msra.mxu0 %v1643_v43  ;;  %v1654_v49 = vld [vmem:[%s2323_s5 + $0x34] ss:$8 sps:$4 sm:$0xff]   ;;  %v1652_v50 = vld [vmem:[%s2323_s5 + $0x30] ss:$8 sps:$4 sm:$0xff]   ;;  %v1657_v51 = vld [vmem:[%s2323_s5 + $0x44] ss:$8 sps:$4 sm:$0xff]  }
  0x12   :  { %519 = vmatprep.subr.bf16.mxu1 %v1607_v14  ;;  %878 = vmatprep.subr.bf16.mxu0 %v1648_v45  ;;  %v1655_v52 = vld [vmem:[%s2323_s5 + $0x40] ss:$8 sps:$4 sm:$0xff]   ;;  %v1660_v53 = vld [vmem:[%s2323_s5 + $0x54] ss:$8 sps:$4 sm:$0xff]   ;;  %v1658_v54 = vld [vmem:[%s2323_s5 + $0x50] ss:$8 sps:$4 sm:$0xff]  }
  0x13   :  { %v1663_v55 = vld [vmem:[%s2323_s5 + $0x64] ss:$8 sps:$4 sm:$0xff]   ;;  %v1661_v56 = vld [vmem:[%s2323_s5 + $0x60] ss:$8 sps:$4 sm:$0xff]   ;;  %v1666_v57 = vld [vmem:[%s2323_s5 + $0x74] ss:$8 sps:$4 sm:$0xff]  }
  0x14   :  { %v1664_v58 = vld [vmem:[%s2323_s5 + $0x70] ss:$8 sps:$4 sm:$0xff]   ;;  %v1669_v59 = vld [vmem:[%s2323_s5 + $0x84] ss:$8 sps:$4 sm:$0xff]   ;;  %v1667_v60 = vld [vmem:[%s2323_s5 + $0x80] ss:$8 sps:$4 sm:$0xff]  }
  0x15   :  { %520 = vmatpush1.bf16.msra.mxu1 %v1609_v15  ;;  %879 = vmatpush1.bf16.msra.mxu0 %v1646_v46  ;;  %v1672_v61 = vld [vmem:[%s2323_s5 + $0x94] ss:$8 sps:$4 sm:$0xff]   ;;  %v1670_v62 = vld [vmem:[%s2323_s5 + $0x90] ss:$8 sps:$4 sm:$0xff]   ;;  %v1675_v63 = vld [vmem:[%s2323_s5 + $0xa4] ss:$8 sps:$4 sm:$0xff]  }
  0x16   :  { %1477 = vmatmul.mubr.msk.bf16.gmra.mrb[8].mxu0 %vm121_vm0, %v1589_v11  ;;  %521 = vmatprep.subr.bf16.mxu1 %v1610_v17  ;;  %v1673_v0 = vld [vmem:[%s2323_s5 + $0xa0] ss:$8 sps:$4 sm:$0xff]   ;;  %v1676_v2 = vld [vmem:[%s2323_s5 + $0xb0] ss:$8 sps:$4 sm:$0xff]   ;;  %v1681_v4 = vld [vmem:[%s2323_s5 + $0xc4] ss:$8 sps:$4 sm:$0xff]  }
  0x17   :  { %208 = vmatprep.mubr.bf16.mxu0 %v1741_v1  ;;  %880 = vmatprep.subr.bf16.mxu0 %v1651_v47  ;;  %v1679_v5 = vld [vmem:[%s2323_s5 + $0xc0] ss:$8 sps:$4 sm:$0xff]   ;;  %v1684_v7 = vld [vmem:[%s2323_s5 + $0xd4] ss:$8 sps:$4 sm:$0xff]   ;;  %v1682_v8 = vld [vmem:[%s2323_s5 + $0xd0] ss:$8 sps:$4 sm:$0xff]  }
  0x18   :  { %v2029_v9 = vsub.s32 0, %v62_v6  ;;  %v59_v10 = vld [vmem:[%s2324_s2] sm:$0x3]  ;;  %v2034_v11 = vsub.s32 1, %v62_v6 }
  0x19   :  { %522 = vmatpush1.bf16.msra.mxu1 %v1612_v18  ;;  %881 = vmatpush1.bf16.msra.mxu0 %v1649_v48 }
  0x1a   :  { %523 = vmatprep.subr.bf16.mxu1 %v1613_v19  ;;  %882 = vmatprep.subr.bf16.mxu0 %v1654_v49  ;;  %v2037_v12 = vrot.slane %v59_v10, %v2029_v9  ;;  %v2040_v13 = vrot.slane %v59_v10, %v2034_v11 }
  0x1d   :  { %524 = vmatpush1.bf16.msra.mxu1 %v1615_v20  ;;  %883 = vmatpush1.bf16.msra.mxu0 %v1652_v50 }
  0x1e   :  { %1478 = vmatmul.mubr.msk.bf16.gmra.mrb[12].mxu0 %vm121_vm0, %v1590_v16  ;;  %525 = vmatprep.subr.bf16.mxu1 %v1616_v22 }
  0x1f   :  { %218 = vmatprep.mubr.bf16.mxu0 %v1741_v1  ;;  %884 = vmatprep.subr.bf16.mxu0 %v1657_v51 }
  0x21   :  { %526 = vmatpush1.bf16.msra.mxu1 %v1618_v23  ;;  %885 = vmatpush1.bf16.msra.mxu0 %v1655_v52 }
  0x22   :  { %527 = vmatprep.subr.bf16.mxu1 %v1619_v24  ;;  %886 = vmatprep.subr.bf16.mxu0 %v1660_v53 }
  0x25   :  { %528 = vmatpush1.bf16.msra.mxu1 %v1621_v25  ;;  %887 = vmatpush1.bf16.msra.mxu0 %v1658_v54 }
  0x26   :  { %1479 = vmatmul.mubr.msk.bf16.gmra.mrb[16].mxu0 %vm121_vm0, %v1591_v21  ;;  %529 = vmatprep.subr.bf16.mxu1 %v1622_v27 }
  0x27   :  { %228 = vmatprep.mubr.bf16.mxu0 %v1741_v1  ;;  %888 = vmatprep.subr.bf16.mxu0 %v1663_v55 }
  0x29   :  { %530 = vmatpush1.bf16.msra.mxu1 %v1624_v28  ;;  %889 = vmatpush1.bf16.msra.mxu0 %v1661_v56 }
  0x2a   :  { %531 = vmatprep.subr.bf16.mxu1 %v1625_v29  ;;  %890 = vmatprep.subr.bf16.mxu0 %v1666_v57 }
  0x2d   :  { %532 = vmatpush1.bf16.msra.mxu1 %v1627_v30  ;;  %891 = vmatpush1.bf16.msra.mxu0 %v1664_v58 }
  0x2e   :  { %1480 = vmatmul.mubr.msk.bf16.gmra.mrb[20].mxu0 %vm121_vm0, %v1592_v26  ;;  %533 = vmatprep.subr.bf16.mxu1 %v1628_v32 }
  0x2f   :  { %238 = vmatprep.mubr.bf16.mxu0 %v1741_v1  ;;  %892 = vmatprep.subr.bf16.mxu0 %v1669_v59 }
  0x31   :  { %534 = vmatpush1.bf16.msra.mxu1 %v1630_v33  ;;  %893 = vmatpush1.bf16.msra.mxu0 %v1667_v60 }
  0x32   :  { %535 = vmatprep.subr.bf16.mxu1 %v1631_v34  ;;  %894 = vmatprep.subr.bf16.mxu0 %v1672_v61 }
  0x35   :  { %536 = vmatpush1.bf16.msra.mxu1 %v1633_v35  ;;  %895 = vmatpush1.bf16.msra.mxu0 %v1670_v62 }
  0x36   :  { %1481 = vmatmul.mubr.msk.bf16.gmra.mrb[24].mxu0 %vm121_vm0, %v1593_v31  ;;  %537 = vmatprep.subr.bf16.mxu1 %v1634_v37 }
  0x37   :  { %248 = vmatprep.mubr.bf16.mxu0 %v1741_v1  ;;  %896 = vmatprep.subr.bf16.mxu0 %v1675_v63  ;;  %v1678_v1 = vld [vmem:[%s2323_s5 + $0xb4] ss:$8 sps:$4 sm:$0xff]  }
  0x39   :  { %538 = vmatpush1.bf16.msra.mxu1 %v1636_v38  ;;  %897 = vmatpush1.bf16.msra.mxu0 %v1673_v0 }
  0x3a   :  { %539 = vmatprep.subr.bf16.mxu1 %v1637_v39  ;;  %898 = vmatprep.subr.bf16.mxu0 %v1678_v1 }
  0x3d   :  { %540 = vmatpush1.bf16.msra.mxu1 %v1639_v40  ;;  %899 = vmatpush1.bf16.msra.mxu0 %v1676_v2 }
  0x3e   :  { %1482 = vmatmul.mubr.msk.bf16.gmra.mrb[28].mxu0 %vm121_vm0, %v1594_v36  ;;  %541 = vmatprep.subr.bf16.mxu1 %v1640_v41 }
  0x3f   :  { %900 = vmatprep.subr.bf16.mxu0 %v1681_v4 }
  0x41   :  { %542 = vmatpush1.bf16.msra.mxu1 %v1642_v42  ;;  %901 = vmatpush1.bf16.msra.mxu0 %v1679_v5 }
  0x42   :  { %902 = vmatprep.subr.bf16.mxu0 %v1684_v7 }
  0x45   :  { %903 = vmatpush1.bf16.msra.mxu0 %v1682_v8 }
  0xd9   :  { %v180_v14 = vpop.f32.mrb[0].mxu0 }
  0xda   :  { %v181_v15 = vadd.f32 %v180_v14, %v2037_v12  ;;  %v182_v16 = vpop.f32.mrb[1].mxu0 }
  0xdb   :  { %v183_v17 = vadd.f32 %v182_v16, %v2040_v13  ;;  %v184_v18 = vpop.f32.mrb[2].mxu0 }
  0xdc   :  { %v185_v19 = vadd.f32 %v184_v18, %v2037_v12  ;;  %v186_v20 = vpop.f32.mrb[3].mxu0  ;;  %v259_v22 = vmax.f32 %v181_v15, 0.0 }
  0xdd   :  { %v187_v21 = vadd.f32 %v186_v20, %v2040_v13  ;;  %v260_v24 = vmax.f32 %v183_v17, 0.0 }
  0xde   :  { %v261_v23 = vmax.f32 %v185_v19, 0.0 }
  0xdf   :  { %v262_v25 = vmax.f32 %v187_v21, 0.0 }
  0xe0   :  { %v291_v26 = vpack.c.bf16 %v261_v23, %v259_v22 }
  0xe1   :  { %v190_v27 = vpop.f32.mrb[4].mxu0  ;;  %v292_v28 = vpack.c.bf16 %v262_v25, %v260_v24 }
  0xe2   :  { %v191_v29 = vadd.f32 %v190_v27, %v2037_v12  ;;  %v192_v30 = vpop.f32.mrb[5].mxu0 }
  0xe3   :  { %v193_v31 = vadd.f32 %v192_v30, %v2040_v13  ;;  %v194_v32 = vpop.f32.mrb[6].mxu0  ;;  %543 = vmatprep.mubr.bf16.mxu1 %v292_v28 }
  0xe4   :  { %v195_v33 = vadd.f32 %v194_v32, %v2037_v12  ;;  %v196_v34 = vpop.f32.mrb[7].mxu0  ;;  %544 = vmatmul.mubr.bf16.vlgmr.msra.gmra.mrb[0].mxu1 %v291_v26  ;;  %v263_v36 = vmax.f32 %v191_v29, 0.0 }
  0xe5   :  { %v197_v35 = vadd.f32 %v196_v34, %v2040_v13  ;;  %v264_v38 = vmax.f32 %v193_v31, 0.0 }
  0xe6   :  { %v265_v37 = vmax.f32 %v195_v33, 0.0 }
  0xe7   :  { %v266_v39 = vmax.f32 %v197_v35, 0.0 }
  0xe8   :  { %v293_v40 = vpack.c.bf16 %v265_v37, %v263_v36 }
  0xe9   :  { %v294_v41 = vpack.c.bf16 %v266_v39, %v264_v38  ;;  %v200_v42 = vpop.f32.mrb[8].mxu0 }
  0xea   :  { %v201_v43 = vadd.f32 %v200_v42, %v2037_v12  ;;  %v202_v44 = vpop.f32.mrb[9].mxu0 }
  0xeb   :  { %v203_v45 = vadd.f32 %v202_v44, %v2040_v13  ;;  %v204_v46 = vpop.f32.mrb[10].mxu0  ;;  %553 = vmatprep.mubr.bf16.mxu1 %v294_v41 }
  0xec   :  { %v205_v47 = vadd.f32 %v204_v46, %v2037_v12  ;;  %v206_v48 = vpop.f32.mrb[11].mxu0  ;;  %554 = vmatmul.mubr.bf16.gmra.mrb[4].mxu1 %v293_v40  ;;  %v267_v50 = vmax.f32 %v201_v43, 0.0 }
  0xed   :  { %v207_v49 = vadd.f32 %v206_v48, %v2040_v13  ;;  %v268_v52 = vmax.f32 %v203_v45, 0.0 }
  0xee   :  { %v269_v51 = vmax.f32 %v205_v47, 0.0 }
  0xef   :  { %v270_v53 = vmax.f32 %v207_v49, 0.0 }
  0xf0   :  { %v295_v54 = vpack.c.bf16 %v269_v51, %v267_v50 }
  0xf1   :  { %v296_v55 = vpack.c.bf16 %v270_v53, %v268_v52  ;;  %v210_v56 = vpop.f32.mrb[12].mxu0 }
  0xf2   :  { %v211_v57 = vadd.f32 %v210_v56, %v2037_v12  ;;  %v212_v58 = vpop.f32.mrb[13].mxu0 }
  0xf3   :  { %v213_v59 = vadd.f32 %v212_v58, %v2040_v13  ;;  %v214_v60 = vpop.f32.mrb[14].mxu0  ;;  %563 = vmatprep.mubr.bf16.mxu1 %v296_v55 }
  0xf4   :  { %v215_v61 = vadd.f32 %v214_v60, %v2037_v12  ;;  %v216_v62 = vpop.f32.mrb[15].mxu0  ;;  %564 = vmatmul.mubr.bf16.gmra.mrb[8].mxu1 %v295_v54  ;;  %v271_v0 = vmax.f32 %v211_v57, 0.0 }
  0xf5   :  { %v217_v63 = vadd.f32 %v216_v62, %v2040_v13  ;;  %v272_v2 = vmax.f32 %v213_v59, 0.0 }
  0xf6   :  { %v273_v1 = vmax.f32 %v215_v61, 0.0 }
  0xf7   :  { %v274_v3 = vmax.f32 %v217_v63, 0.0 }
  0xf8   :  { %v297_v4 = vpack.c.bf16 %v273_v1, %v271_v0 }
  0xf9   :  { %v298_v5 = vpack.c.bf16 %v274_v3, %v272_v2  ;;  %v220_v6 = vpop.f32.mrb[16].mxu0  ;;  %v1687_v2 = vld [vmem:[%s2323_s5 + $0xe4] ss:$8 sps:$4 sm:$0xff]   ;;  %v1688_v3 = vld [vmem:[%s2323_s5 + $0xf0] ss:$8 sps:$4 sm:$0xff]  }
  0xfa   :  { %v221_v7 = vadd.f32 %v220_v6, %v2037_v12  ;;  %v222_v8 = vpop.f32.mrb[17].mxu0  ;;  %904 = vmatprep.subr.bf16.mxu0 %v1687_v2  ;;  %v1696_v6 = vld [vmem:[%s2325_s7 + $0x14] ss:$8 sps:$4 sm:$0xff]  }
  0xfb   :  { %v223_v10 = vadd.f32 %v222_v8, %v2040_v13  ;;  %v224_v14 = vpop.f32.mrb[18].mxu0  ;;  %573 = vmatprep.mubr.bf16.mxu1 %v298_v5  ;;  %v1693_v5 = vld [vmem:[%s2325_s7 + $0x4] ss:$8 sps:$4 sm:$0xff]  }
  0xfc   :  { %v225_v15 = vadd.f32 %v224_v14, %v2037_v12  ;;  %v226_v16 = vpop.f32.mrb[19].mxu0  ;;  %574 = vmatmul.mubr.bf16.gmra.mrb[12].mxu1 %v297_v4  ;;  %v275_v18 = vmax.f32 %v221_v7, 0.0  ;;  %v1691_v4 = vld [vmem:[%s2325_s7] ss:$8 sps:$4 sm:$0xff]   ;;  %1241 = vmatprep.subr.bf16.mxu1 %v1693_v5  ;;  %v1694_v7 = vld [vmem:[%s2325_s7 + $0x10] ss:$8 sps:$4 sm:$0xff]  }
  0xfd   :  { %v227_v17 = vadd.f32 %v226_v16, %v2040_v13  ;;  %v276_v20 = vmax.f32 %v223_v10, 0.0  ;;  %1242 = vmatpush1.bf16.msra.mxu1 %v1691_v4  ;;  %v1699_v8 = vld [vmem:[%s2325_s7 + $0x24] ss:$8 sps:$4 sm:$0xff]   ;;  %v1697_v10 = vld [vmem:[%s2325_s7 + $0x20] ss:$8 sps:$4 sm:$0xff]  }
  0xfe   :  { %v277_v19 = vmax.f32 %v225_v15, 0.0  ;;  %1243 = vmatprep.subr.bf16.mxu1 %v1696_v6  ;;  %v1702_v14 = vld [vmem:[%s2325_s7 + $0x34] ss:$8 sps:$4 sm:$0xff]   ;;  %v1700_v15 = vld [vmem:[%s2325_s7 + $0x30] ss:$8 sps:$4 sm:$0xff]  }
  0xff   :  { %v278_v21 = vmax.f32 %v227_v17, 0.0  ;;  %v1705_v16 = vld [vmem:[%s2325_s7 + $0x44] ss:$8 sps:$4 sm:$0xff]   ;;  %v1703_v17 = vld [vmem:[%s2325_s7 + $0x40] ss:$8 sps:$4 sm:$0xff]  }
 0x100   :  { %v299_v22 = vpack.c.bf16 %v277_v19, %v275_v18  ;;  %v1708_v18 = vld [vmem:[%s2325_s7 + $0x54] ss:$8 sps:$4 sm:$0xff]   ;;  %v1706_v19 = vld [vmem:[%s2325_s7 + $0x50] ss:$8 sps:$4 sm:$0xff]  }
 0x101   :  { %v300_v23 = vpack.c.bf16 %v278_v21, %v276_v20  ;;  %v230_v24 = vpop.f32.mrb[20].mxu0  ;;  %1244 = vmatpush1.bf16.msra.mxu1 %v1694_v7  ;;  %v1711_v20 = vld [vmem:[%s2325_s7 + $0x64] ss:$8 sps:$4 sm:$0xff]   ;;  %v1709_v21 = vld [vmem:[%s2325_s7 + $0x60] ss:$8 sps:$4 sm:$0xff]  }
 0x102   :  { %v231_v25 = vadd.f32 %v230_v24, %v2037_v12  ;;  %v232_v26 = vpop.f32.mrb[21].mxu0  ;;  %1245 = vmatprep.subr.bf16.mxu1 %v1699_v8  ;;  %v1717_v24 = vld [vmem:[%s2325_s7 + $0x84] ss:$8 sps:$4 sm:$0xff]  }
 0x103   :  { %v233_v27 = vadd.f32 %v232_v26, %v2040_v13  ;;  %v234_v28 = vpop.f32.mrb[22].mxu0  ;;  %583 = vmatprep.mubr.bf16.mxu1 %v300_v23  ;;  %v1712_v23 = vld [vmem:[%s2325_s7 + $0x70] ss:$8 sps:$4 sm:$0xff]   ;;  %v1720_v26 = vld [vmem:[%s2325_s7 + $0x94] ss:$8 sps:$4 sm:$0xff]  }
 0x104   :  { %v235_v29 = vadd.f32 %v234_v28, %v2037_v12  ;;  %v236_v30 = vpop.f32.mrb[23].mxu0  ;;  %584 = vmatmul.mubr.bf16.gmra.mrb[16].mxu1 %v299_v22  ;;  %v279_v32 = vmax.f32 %v231_v25, 0.0  ;;  %v1714_v22 = vld [vmem:[%s2325_s7 + $0x74] ss:$8 sps:$4 sm:$0xff]   ;;  %v1715_v25 = vld [vmem:[%s2325_s7 + $0x80] ss:$8 sps:$4 sm:$0xff]  }
 0x105   :  { %v237_v31 = vadd.f32 %v236_v30, %v2040_v13  ;;  %v280_v34 = vmax.f32 %v233_v27, 0.0  ;;  %1246 = vmatpush1.bf16.msra.mxu1 %v1697_v10  ;;  %v1718_v27 = vld [vmem:[%s2325_s7 + $0x90] ss:$8 sps:$4 sm:$0xff]   ;;  %v1723_v28 = vld [vmem:[%s2325_s7 + $0xa4] ss:$8 sps:$4 sm:$0xff]  }
 0x106   :  { %v281_v33 = vmax.f32 %v235_v29, 0.0  ;;  %1247 = vmatprep.subr.bf16.mxu1 %v1702_v14  ;;  %v1721_v29 = vld [vmem:[%s2325_s7 + $0xa0] ss:$8 sps:$4 sm:$0xff]   ;;  %v1726_v30 = vld [vmem:[%s2325_s7 + $0xb4] ss:$8 sps:$4 sm:$0xff]  }
 0x107   :  { %v282_v35 = vmax.f32 %v237_v31, 0.0  ;;  %v1724_v31 = vld [vmem:[%s2325_s7 + $0xb0] ss:$8 sps:$4 sm:$0xff]  }
 0x108   :  { %v301_v36 = vpack.c.bf16 %v281_v33, %v279_v32  ;;  %v1729_v32 = vld [vmem:[%s2325_s7 + $0xc4] ss:$8 sps:$4 sm:$0xff]   ;;  %v1727_v33 = vld [vmem:[%s2325_s7 + $0xc0] ss:$8 sps:$4 sm:$0xff]  }
 0x109   :  { %v302_v37 = vpack.c.bf16 %v282_v35, %v280_v34  ;;  %v240_v38 = vpop.f32.mrb[24].mxu0  ;;  %1248 = vmatpush1.bf16.msra.mxu1 %v1700_v15  ;;  %v1732_v34 = vld [vmem:[%s2325_s7 + $0xd4] ss:$8 sps:$4 sm:$0xff]   ;;  %v1730_v35 = vld [vmem:[%s2325_s7 + $0xd0] ss:$8 sps:$4 sm:$0xff]  }
 0x10a   :  { %v241_v39 = vadd.f32 %v240_v38, %v2037_v12  ;;  %v242_v40 = vpop.f32.mrb[25].mxu0  ;;  %1249 = vmatprep.subr.bf16.mxu1 %v1705_v16 }
 0x10b   :  { %v243_v41 = vadd.f32 %v242_v40, %v2040_v13  ;;  %v244_v42 = vpop.f32.mrb[26].mxu0  ;;  %593 = vmatprep.mubr.bf16.mxu1 %v302_v37 }
 0x10c   :  { %v245_v43 = vadd.f32 %v244_v42, %v2037_v12  ;;  %v246_v44 = vpop.f32.mrb[27].mxu0  ;;  %594 = vmatmul.mubr.bf16.gmra.mrb[20].mxu1 %v301_v36  ;;  %v283_v46 = vmax.f32 %v241_v39, 0.0  ;;  %v339_v36 = vld [vmem:[%s2326_s4] sm:$0x3] }
 0x10d   :  { %v247_v45 = vadd.f32 %v246_v44, %v2040_v13  ;;  %v284_v48 = vmax.f32 %v243_v41, 0.0  ;;  %1250 = vmatpush1.bf16.msra.mxu1 %v1703_v17  ;;  %v2174_v37 = vrot.slane %v339_v36, %v2029_v9  ;;  %v2177_v38 = vrot.slane %v339_v36, %v2034_v11 }
 0x10e   :  { %v285_v47 = vmax.f32 %v245_v43, 0.0  ;;  %1251 = vmatprep.subr.bf16.mxu1 %v1708_v18 }
 0x10f   :  { %v286_v49 = vmax.f32 %v247_v45, 0.0 }
 0x110   :  { %v303_v50 = vpack.c.bf16 %v285_v47, %v283_v46 }
 0x111   :  { %v304_v51 = vpack.c.bf16 %v286_v49, %v284_v48  ;;  %v250_v52 = vpop.f32.mrb[28].mxu0  ;;  %1252 = vmatpush1.bf16.msra.mxu1 %v1706_v19 }
 0x112   :  { %v251_v53 = vadd.f32 %v250_v52, %v2037_v12  ;;  %v252_v54 = vpop.f32.mrb[29].mxu0  ;;  %1253 = vmatprep.subr.bf16.mxu1 %v1711_v20 }
 0x113   :  { %v253_v55 = vadd.f32 %v252_v54, %v2040_v13  ;;  %v254_v56 = vpop.f32.mrb[30].mxu0  ;;  %603 = vmatprep.mubr.bf16.mxu1 %v304_v51 }
 0x114   :  { %v255_v57 = vadd.f32 %v254_v56, %v2037_v12  ;;  %v256_v58 = vpop.f32.mrb[31].mxu0  ;;  %604 = vmatmul.mubr.bf16.gmra.mrb[24].mxu1 %v303_v50  ;;  %v287_v60 = vmax.f32 %v251_v53, 0.0  ;;  %v1685_v12 = vld [vmem:[%s2323_s5 + $0xe0] ss:$8 sps:$4 sm:$0xff]  }
 0x115   :  { %v257_v59 = vadd.f32 %v256_v58, %v2040_v13  ;;  %v288_v62 = vmax.f32 %v253_v55, 0.0  ;;  %905 = vmatpush1.bf16.msra.mxu0 %v1685_v12  ;;  %v1690_v13 = vld [vmem:[%s2323_s5 + $0xf4] ss:$8 sps:$4 sm:$0xff]   ;;  %1254 = vmatpush1.bf16.msra.mxu1 %v1709_v21 }
 0x116   :  { %v289_v61 = vmax.f32 %v255_v57, 0.0  ;;  %906 = vmatprep.subr.bf16.mxu0 %v1690_v13  ;;  %1255 = vmatprep.subr.bf16.mxu1 %v1714_v22 }
 0x117   :  { %v290_v63 = vmax.f32 %v257_v59, 0.0 }
 0x118   :  { %v305_v0 = vpack.c.bf16 %v289_v61, %v287_v60 }
 0x119   :  { %v306_v1 = vpack.c.bf16 %v290_v63, %v288_v62  ;;  %907 = vmatpush1.bf16.msra.mxu0 %v1688_v3  ;;  %1256 = vmatpush1.bf16.msra.mxu1 %v1712_v23 }
 0x11a   :  { %1257 = vmatprep.subr.bf16.mxu1 %v1717_v24 }
 0x11b   :  { %613 = vmatprep.mubr.bf16.mxu1 %v306_v1 }
 0x11c   :  { %614 = vmatmul.mubr.bf16.gmra.mrb[28].mxu1 %v305_v0 }
 0x11d   :  { %1258 = vmatpush1.bf16.msra.mxu1 %v1715_v25 }
 0x11e   :  { %1259 = vmatprep.subr.bf16.mxu1 %v1720_v26 }
 0x121   :  { %1260 = vmatpush1.bf16.msra.mxu1 %v1718_v27 }
 0x122   :  { %1261 = vmatprep.subr.bf16.mxu1 %v1723_v28 }
 0x125   :  { %1262 = vmatpush1.bf16.msra.mxu1 %v1721_v29 }
 0x126   :  { %1263 = vmatprep.subr.bf16.mxu1 %v1726_v30 }
 0x129   :  { %1264 = vmatpush1.bf16.msra.mxu1 %v1724_v31 }
 0x12a   :  { %1265 = vmatprep.subr.bf16.mxu1 %v1729_v32 }
 0x12d   :  { %1266 = vmatpush1.bf16.msra.mxu1 %v1727_v33 }
 0x12e   :  { %1267 = vmatprep.subr.bf16.mxu1 %v1732_v34 }
 0x131   :  { %1268 = vmatpush1.bf16.msra.mxu1 %v1730_v35 }
 0x1b7   :  { %v545_v39 = vpop.f32.mrb[0].mxu1 }
 0x1b8   :  { %v546_v40 = vadd.f32 %v545_v39, %v2174_v37  ;;  %v547_v41 = vpop.f32.mrb[1].mxu1 }
 0x1b9   :  { %v548_v42 = vadd.f32 %v547_v41, %v2177_v38  ;;  %v549_v43 = vpop.f32.mrb[2].mxu1 }
 0x1ba   :  { %v550_v44 = vadd.f32 %v549_v43, %v2174_v37  ;;  %v551_v45 = vpop.f32.mrb[3].mxu1  ;;  %v624_v47 = vmax.f32 %v546_v40, 0.0 }
 0x1bb   :  { %v552_v46 = vadd.f32 %v551_v45, %v2177_v38  ;;  %v625_v49 = vmax.f32 %v548_v42, 0.0 }
 0x1bc   :  { %v626_v48 = vmax.f32 %v550_v44, 0.0 }
 0x1bd   :  { %v627_v50 = vmax.f32 %v552_v46, 0.0 }
 0x1be   :  { %v656_v51 = vpack.c.bf16 %v626_v48, %v624_v47 }
 0x1bf   :  { %v657_v52 = vpack.c.bf16 %v627_v50, %v625_v49  ;;  %v555_v53 = vpop.f32.mrb[4].mxu1 }
 0x1c0   :  { %v556_v54 = vadd.f32 %v555_v53, %v2174_v37  ;;  %v557_v55 = vpop.f32.mrb[5].mxu1 }
 0x1c1   :  { %v558_v56 = vadd.f32 %v557_v55, %v2177_v38  ;;  %v559_v57 = vpop.f32.mrb[6].mxu1  ;;  %908 = vmatprep.mubr.bf16.mxu0 %v657_v52 }
 0x1c2   :  { %v560_v58 = vadd.f32 %v559_v57, %v2174_v37  ;;  %v561_v59 = vpop.f32.mrb[7].mxu1  ;;  %909 = vmatmul.mubr.bf16.vlgmr.msra.gmra.mrb[32].mxu0 %v656_v51  ;;  %v628_v61 = vmax.f32 %v556_v54, 0.0 }
 0x1c3   :  { %v562_v60 = vadd.f32 %v561_v59, %v2177_v38  ;;  %v629_v63 = vmax.f32 %v558_v56, 0.0 }
 0x1c4   :  { %v630_v62 = vmax.f32 %v560_v58, 0.0 }
 0x1c5   :  { %v631_v0 = vmax.f32 %v562_v60, 0.0 }
 0x1c6   :  { %v658_v1 = vpack.c.bf16 %v630_v62, %v628_v61 }
 0x1c7   :  { %v659_v2 = vpack.c.bf16 %v631_v0, %v629_v63  ;;  %v565_v12 = vpop.f32.mrb[8].mxu1 }
 0x1c8   :  { %v566_v13 = vadd.f32 %v565_v12, %v2174_v37  ;;  %v567_v3 = vpop.f32.mrb[9].mxu1 }
 0x1c9   :  { %v568_v4 = vadd.f32 %v567_v3, %v2177_v38  ;;  %v569_v5 = vpop.f32.mrb[10].mxu1  ;;  %918 = vmatprep.mubr.bf16.mxu0 %v659_v2 }
 0x1ca   :  { %v570_v6 = vadd.f32 %v569_v5, %v2174_v37  ;;  %v571_v7 = vpop.f32.mrb[11].mxu1  ;;  %919 = vmatmul.mubr.bf16.gmra.mrb[36].mxu0 %v658_v1  ;;  %v632_v10 = vmax.f32 %v566_v13, 0.0 }
 0x1cb   :  { %v572_v8 = vadd.f32 %v571_v7, %v2177_v38  ;;  %v633_v15 = vmax.f32 %v568_v4, 0.0 }
 0x1cc   :  { %v634_v14 = vmax.f32 %v570_v6, 0.0 }
 0x1cd   :  { %v635_v16 = vmax.f32 %v572_v8, 0.0 }
 0x1ce   :  { %v660_v17 = vpack.c.bf16 %v634_v14, %v632_v10 }
 0x1cf   :  { %v661_v18 = vpack.c.bf16 %v635_v16, %v633_v15  ;;  %v575_v19 = vpop.f32.mrb[12].mxu1 }
 0x1d0   :  { %v576_v20 = vadd.f32 %v575_v19, %v2174_v37  ;;  %v577_v21 = vpop.f32.mrb[13].mxu1 }
 0x1d1   :  { %v578_v22 = vadd.f32 %v577_v21, %v2177_v38  ;;  %v579_v23 = vpop.f32.mrb[14].mxu1  ;;  %928 = vmatprep.mubr.bf16.mxu0 %v661_v18 }
 0x1d2   :  { %v580_v24 = vadd.f32 %v579_v23, %v2174_v37  ;;  %v581_v25 = vpop.f32.mrb[15].mxu1  ;;  %929 = vmatmul.mubr.bf16.gmra.mrb[40].mxu0 %v660_v17  ;;  %v636_v27 = vmax.f32 %v576_v20, 0.0 }
 0x1d3   :  { %v582_v26 = vadd.f32 %v581_v25, %v2177_v38  ;;  %v637_v29 = vmax.f32 %v578_v22, 0.0 }
 0x1d4   :  { %v638_v28 = vmax.f32 %v580_v24, 0.0 }
 0x1d5   :  { %v639_v30 = vmax.f32 %v582_v26, 0.0 }
 0x1d6   :  { %v662_v31 = vpack.c.bf16 %v638_v28, %v636_v27 }
 0x1d7   :  { %v663_v32 = vpack.c.bf16 %v639_v30, %v637_v29  ;;  %v585_v33 = vpop.f32.mrb[16].mxu1  ;;  %v1735_v29 = vld [vmem:[%s2325_s7 + $0xe4] ss:$8 sps:$4 sm:$0xff]   ;;  %v1736_v30 = vld [vmem:[%s2325_s7 + $0xf0] ss:$8 sps:$4 sm:$0xff]  }
 0x1d8   :  { %v586_v34 = vadd.f32 %v585_v33, %v2174_v37  ;;  %v587_v35 = vpop.f32.mrb[17].mxu1  ;;  %1269 = vmatprep.subr.bf16.mxu1 %v1735_v29 }
 0x1d9   :  { %v588_v36 = vadd.f32 %v587_v35, %v2177_v38  ;;  %v589_v39 = vpop.f32.mrb[18].mxu1  ;;  %938 = vmatprep.mubr.bf16.mxu0 %v663_v32 }
 0x1da   :  { %v590_v40 = vadd.f32 %v589_v39, %v2174_v37  ;;  %v591_v41 = vpop.f32.mrb[19].mxu1  ;;  %939 = vmatmul.mubr.bf16.gmra.mrb[44].mxu0 %v662_v31  ;;  %v640_v43 = vmax.f32 %v586_v34, 0.0  ;;  %v704_v31 = vld [vmem:[%s2327_s6] sm:$0x3] }
 0x1db   :  { %v592_v42 = vadd.f32 %v591_v41, %v2177_v38  ;;  %v641_v45 = vmax.f32 %v588_v36, 0.0  ;;  %v2227_v32 = vrot.slane %v704_v31, %v2029_v9  ;;  %v2230_v33 = vrot.slane %v704_v31, %v2034_v11 }
 0x1dc   :  { %v642_v44 = vmax.f32 %v590_v40, 0.0 }
 0x1dd   :  { %v643_v46 = vmax.f32 %v592_v42, 0.0 }
 0x1de   :  { %v664_v47 = vpack.c.bf16 %v642_v44, %v640_v43 }
 0x1df   :  { %v665_v48 = vpack.c.bf16 %v643_v46, %v641_v45  ;;  %v595_v49 = vpop.f32.mrb[20].mxu1 }
 0x1e0   :  { %v596_v50 = vadd.f32 %v595_v49, %v2174_v37  ;;  %v597_v51 = vpop.f32.mrb[21].mxu1 }
 0x1e1   :  { %v598_v52 = vadd.f32 %v597_v51, %v2177_v38  ;;  %v599_v53 = vpop.f32.mrb[22].mxu1  ;;  %948 = vmatprep.mubr.bf16.mxu0 %v665_v48 }
 0x1e2   :  { %v600_v54 = vadd.f32 %v599_v53, %v2174_v37  ;;  %v601_v55 = vpop.f32.mrb[23].mxu1  ;;  %949 = vmatmul.mubr.bf16.gmra.mrb[48].mxu0 %v664_v47  ;;  %v644_v57 = vmax.f32 %v596_v50, 0.0 }
 0x1e3   :  { %v602_v56 = vadd.f32 %v601_v55, %v2177_v38  ;;  %v645_v59 = vmax.f32 %v598_v52, 0.0 }
 0x1e4   :  { %v646_v58 = vmax.f32 %v600_v54, 0.0 }
 0x1e5   :  { %v647_v60 = vmax.f32 %v602_v56, 0.0 }
 0x1e6   :  { %v666_v61 = vpack.c.bf16 %v646_v58, %v644_v57 }
 0x1e7   :  { %v667_v62 = vpack.c.bf16 %v647_v60, %v645_v59  ;;  %v605_v63 = vpop.f32.mrb[24].mxu1 }
 0x1e8   :  { %v606_v0 = vadd.f32 %v605_v63, %v2174_v37  ;;  %v607_v1 = vpop.f32.mrb[25].mxu1 }
 0x1e9   :  { %v608_v2 = vadd.f32 %v607_v1, %v2177_v38  ;;  %v609_v12 = vpop.f32.mrb[26].mxu1  ;;  %958 = vmatprep.mubr.bf16.mxu0 %v667_v62 }
 0x1ea   :  { %v610_v13 = vadd.f32 %v609_v12, %v2174_v37  ;;  %v611_v3 = vpop.f32.mrb[27].mxu1  ;;  %959 = vmatmul.mubr.bf16.gmra.mrb[52].mxu0 %v666_v61  ;;  %v648_v5 = vmax.f32 %v606_v0, 0.0 }
 0x1eb   :  { %v612_v4 = vadd.f32 %v611_v3, %v2177_v38  ;;  %v649_v7 = vmax.f32 %v608_v2, 0.0 }
 0x1ec   :  { %v650_v6 = vmax.f32 %v610_v13, 0.0 }
 0x1ed   :  { %v651_v8 = vmax.f32 %v612_v4, 0.0 }
 0x1ee   :  { %v668_v10 = vpack.c.bf16 %v650_v6, %v648_v5 }
 0x1ef   :  { %v669_v14 = vpack.c.bf16 %v651_v8, %v649_v7  ;;  %v615_v15 = vpop.f32.mrb[28].mxu1 }
 0x1f0   :  { %v616_v16 = vadd.f32 %v615_v15, %v2174_v37  ;;  %v617_v17 = vpop.f32.mrb[29].mxu1 }
 0x1f1   :  { %v618_v18 = vadd.f32 %v617_v17, %v2177_v38  ;;  %v619_v19 = vpop.f32.mrb[30].mxu1  ;;  %968 = vmatprep.mubr.bf16.mxu0 %v669_v14 }
 0x1f2   :  { %v620_v20 = vadd.f32 %v619_v19, %v2174_v37  ;;  %v621_v21 = vpop.f32.mrb[31].mxu1  ;;  %969 = vmatmul.mubr.bf16.gmra.mrb[56].mxu0 %v668_v10  ;;  %v652_v23 = vmax.f32 %v616_v16, 0.0  ;;  %v1733_v37 = vld [vmem:[%s2325_s7 + $0xe0] ss:$8 sps:$4 sm:$0xff]  }
 0x1f3   :  { %v622_v22 = vadd.f32 %v621_v21, %v2177_v38  ;;  %v653_v25 = vmax.f32 %v618_v18, 0.0  ;;  %1270 = vmatpush1.bf16.msra.mxu1 %v1733_v37  ;;  %v1738_v38 = vld [vmem:[%s2325_s7 + $0xf4] ss:$8 sps:$4 sm:$0xff]  }
 0x1f4   :  { %v654_v24 = vmax.f32 %v620_v20, 0.0  ;;  %1271 = vmatprep.subr.bf16.mxu1 %v1738_v38 }
 0x1f5   :  { %v655_v26 = vmax.f32 %v622_v22, 0.0 }
 0x1f6   :  { %v670_v27 = vpack.c.bf16 %v654_v24, %v652_v23 }
 0x1f7   :  { %v671_v28 = vpack.c.bf16 %v655_v26, %v653_v25  ;;  %1272 = vmatpush1.bf16.msra.mxu1 %v1736_v30 }
 0x1f9   :  { %978 = vmatprep.mubr.bf16.mxu0 %v671_v28 }
 0x1fa   :  { %979 = vmatmul.mubr.bf16.gmra.mrb[60].mxu0 %v670_v27 }
 0x295   :  { %v910_v34 = vpop.f32.mrb[32].mxu0 }
 0x296   :  { %v911_v35 = vadd.f32 %v910_v34, %v2227_v32  ;;  %v912_v36 = vpop.f32.mrb[33].mxu0 }
 0x297   :  { %v913_v39 = vadd.f32 %v912_v36, %v2230_v33  ;;  %v914_v40 = vpop.f32.mrb[34].mxu0 }
 0x298   :  { %v915_v41 = vadd.f32 %v914_v40, %v2227_v32  ;;  %v916_v42 = vpop.f32.mrb[35].mxu0  ;;  %v989_v44 = vmax.f32 %v911_v35, 0.0 }
 0x299   :  { %v917_v43 = vadd.f32 %v916_v42, %v2230_v33  ;;  %v990_v46 = vmax.f32 %v913_v39, 0.0 }
 0x29a   :  { %v991_v45 = vmax.f32 %v915_v41, 0.0 }
 0x29b   :  { %v992_v47 = vmax.f32 %v917_v43, 0.0 }
 0x29c   :  { %v1021_v48 = vpack.c.bf16 %v991_v45, %v989_v44 }
 0x29d   :  { %v1022_v49 = vpack.c.bf16 %v992_v47, %v990_v46  ;;  %v920_v50 = vpop.f32.mrb[36].mxu0 }
 0x29e   :  { %v921_v51 = vadd.f32 %v920_v50, %v2227_v32  ;;  %v922_v52 = vpop.f32.mrb[37].mxu0 }
 0x29f   :  { %v923_v53 = vadd.f32 %v922_v52, %v2230_v33  ;;  %v924_v54 = vpop.f32.mrb[38].mxu0  ;;  %1273 = vmatprep.mubr.bf16.mxu1 %v1022_v49 }
 0x2a0   :  { %v925_v55 = vadd.f32 %v924_v54, %v2227_v32  ;;  %v926_v56 = vpop.f32.mrb[39].mxu0  ;;  %1274 = vmatmul.mubr.bf16.vlgmr.msra.gmra.mrb[32].mxu1 %v1021_v48  ;;  %v993_v58 = vmax.f32 %v921_v51, 0.0 }
 0x2a1   :  { %v927_v57 = vadd.f32 %v926_v56, %v2230_v33  ;;  %v994_v60 = vmax.f32 %v923_v53, 0.0 }
 0x2a2   :  { %v995_v59 = vmax.f32 %v925_v55, 0.0 }
 0x2a3   :  { %v996_v61 = vmax.f32 %v927_v57, 0.0 }
 0x2a4   :  { %v1023_v62 = vpack.c.bf16 %v995_v59, %v993_v58 }
 0x2a5   :  { %v1024_v63 = vpack.c.bf16 %v996_v61, %v994_v60  ;;  %v930_v0 = vpop.f32.mrb[40].mxu0 }
 0x2a6   :  { %v931_v1 = vadd.f32 %v930_v0, %v2227_v32  ;;  %v932_v2 = vpop.f32.mrb[41].mxu0 }
 0x2a7   :  { %v933_v12 = vadd.f32 %v932_v2, %v2230_v33  ;;  %v934_v13 = vpop.f32.mrb[42].mxu0  ;;  %1283 = vmatprep.mubr.bf16.mxu1 %v1024_v63 }
 0x2a8   :  { %v935_v3 = vadd.f32 %v934_v13, %v2227_v32  ;;  %v936_v4 = vpop.f32.mrb[43].mxu0  ;;  %1284 = vmatmul.mubr.bf16.gmra.mrb[36].mxu1 %v1023_v62  ;;  %v997_v6 = vmax.f32 %v931_v1, 0.0 }
 0x2a9   :  { %v937_v5 = vadd.f32 %v936_v4, %v2230_v33  ;;  %v998_v8 = vmax.f32 %v933_v12, 0.0 }
 0x2aa   :  { %v999_v7 = vmax.f32 %v935_v3, 0.0 }
 0x2ab   :  { %v1000_v10 = vmax.f32 %v937_v5, 0.0 }
 0x2ac   :  { %v1025_v14 = vpack.c.bf16 %v999_v7, %v997_v6 }
 0x2ad   :  { %v1026_v15 = vpack.c.bf16 %v1000_v10, %v998_v8  ;;  %v940_v16 = vpop.f32.mrb[44].mxu0 }
 0x2ae   :  { %v941_v17 = vadd.f32 %v940_v16, %v2227_v32  ;;  %v942_v18 = vpop.f32.mrb[45].mxu0 }
 0x2af   :  { %v943_v19 = vadd.f32 %v942_v18, %v2230_v33  ;;  %v944_v20 = vpop.f32.mrb[46].mxu0  ;;  %1293 = vmatprep.mubr.bf16.mxu1 %v1026_v15 }
 0x2b0   :  { %v945_v21 = vadd.f32 %v944_v20, %v2227_v32  ;;  %v946_v22 = vpop.f32.mrb[47].mxu0  ;;  %1294 = vmatmul.mubr.bf16.gmra.mrb[40].mxu1 %v1025_v14  ;;  %v1001_v24 = vmax.f32 %v941_v17, 0.0 }
 0x2b1   :  { %v947_v23 = vadd.f32 %v946_v22, %v2230_v33  ;;  %v1002_v26 = vmax.f32 %v943_v19, 0.0 }
 0x2b2   :  { %v1003_v25 = vmax.f32 %v945_v21, 0.0 }
 0x2b3   :  { %v1004_v27 = vmax.f32 %v947_v23, 0.0 }
 0x2b4   :  { %v1027_v28 = vpack.c.bf16 %v1003_v25, %v1001_v24 }
 0x2b5   :  { %v1028_v29 = vpack.c.bf16 %v1004_v27, %v1002_v26  ;;  %v950_v37 = vpop.f32.mrb[48].mxu0  ;;  %v2267_v26 = vld [vmem:[%s2328_s9] sm:$0xff] }
 0x2b6   :  { %v951_v38 = vadd.f32 %v950_v37, %v2227_v32  ;;  %v952_v30 = vpop.f32.mrb[49].mxu0 }
 0x2b7   :  { %v953_v31 = vadd.f32 %v952_v30, %v2230_v33  ;;  %v954_v34 = vpop.f32.mrb[50].mxu0  ;;  %1303 = vmatprep.mubr.bf16.mxu1 %v1028_v29 }
 0x2b8   :  { %v955_v35 = vadd.f32 %v954_v34, %v2227_v32  ;;  %v956_v36 = vpop.f32.mrb[51].mxu0  ;;  %1304 = vmatmul.mubr.bf16.gmra.mrb[44].mxu1 %v1027_v28  ;;  %v1005_v40 = vmax.f32 %v951_v38, 0.0  ;;  %v1069_v28 = vld [vmem:[%s2330_s8] sm:$0x3] }
 0x2b9   :  { %v957_v39 = vadd.f32 %v956_v36, %v2230_v33  ;;  %v1006_v42 = vmax.f32 %v953_v31, 0.0  ;;  %v2278_v29 = vrot.slane %v1069_v28, %v2029_v9  ;;  %v2281_v37 = vrot.slane %v1069_v28, %v2034_v11 }
 0x2ba   :  { %v1007_v41 = vmax.f32 %v955_v35, 0.0 }
 0x2bb   :  { %v1008_v43 = vmax.f32 %v957_v39, 0.0 }
 0x2bc   :  { %v1029_v44 = vpack.c.bf16 %v1007_v41, %v1005_v40 }
 0x2bd   :  { %v1030_v45 = vpack.c.bf16 %v1008_v43, %v1006_v42  ;;  %v960_v46 = vpop.f32.mrb[52].mxu0 }
 0x2be   :  { %v961_v47 = vadd.f32 %v960_v46, %v2227_v32  ;;  %v962_v48 = vpop.f32.mrb[53].mxu0 }
 0x2bf   :  { %v963_v49 = vadd.f32 %v962_v48, %v2230_v33  ;;  %v964_v50 = vpop.f32.mrb[54].mxu0  ;;  %1313 = vmatprep.mubr.bf16.mxu1 %v1030_v45 }
 0x2c0   :  { %v965_v51 = vadd.f32 %v964_v50, %v2227_v32  ;;  %v966_v52 = vpop.f32.mrb[55].mxu0  ;;  %1314 = vmatmul.mubr.bf16.gmra.mrb[48].mxu1 %v1029_v44  ;;  %v1009_v54 = vmax.f32 %v961_v47, 0.0 }
 0x2c1   :  { %v967_v53 = vadd.f32 %v966_v52, %v2230_v33  ;;  %v1010_v56 = vmax.f32 %v963_v49, 0.0 }
 0x2c2   :  { %v1011_v55 = vmax.f32 %v965_v51, 0.0 }
 0x2c3   :  { %v1012_v57 = vmax.f32 %v967_v53, 0.0 }
 0x2c4   :  { %v1031_v58 = vpack.c.bf16 %v1011_v55, %v1009_v54 }
 0x2c5   :  { %v1032_v59 = vpack.c.bf16 %v1012_v57, %v1010_v56  ;;  %v970_v60 = vpop.f32.mrb[56].mxu0 }
 0x2c6   :  { %v971_v61 = vadd.f32 %v970_v60, %v2227_v32  ;;  %v972_v62 = vpop.f32.mrb[57].mxu0 }
 0x2c7   :  { %v973_v63 = vadd.f32 %v972_v62, %v2230_v33  ;;  %v974_v0 = vpop.f32.mrb[58].mxu0  ;;  %1323 = vmatprep.mubr.bf16.mxu1 %v1032_v59 }
 0x2c8   :  { %v975_v1 = vadd.f32 %v974_v0, %v2227_v32  ;;  %v976_v2 = vpop.f32.mrb[59].mxu0  ;;  %1324 = vmatmul.mubr.bf16.gmra.mrb[52].mxu1 %v1031_v58  ;;  %v1013_v13 = vmax.f32 %v971_v61, 0.0 }
 0x2c9   :  { %v977_v12 = vadd.f32 %v976_v2, %v2230_v33  ;;  %v1014_v4 = vmax.f32 %v973_v63, 0.0 }
 0x2ca   :  { %v1015_v3 = vmax.f32 %v975_v1, 0.0 }
 0x2cb   :  { %v1016_v5 = vmax.f32 %v977_v12, 0.0 }
 0x2cc   :  { %v1033_v6 = vpack.c.bf16 %v1015_v3, %v1013_v13 }
 0x2cd   :  { %v1034_v7 = vpack.c.bf16 %v1016_v5, %v1014_v4  ;;  %v980_v8 = vpop.f32.mrb[60].mxu0 }
 0x2ce   :  { %v981_v10 = vadd.f32 %v980_v8, %v2227_v32  ;;  %v982_v14 = vpop.f32.mrb[61].mxu0 }
 0x2cf   :  { %v983_v15 = vadd.f32 %v982_v14, %v2230_v33  ;;  %v984_v16 = vpop.f32.mrb[62].mxu0  ;;  %1333 = vmatprep.mubr.bf16.mxu1 %v1034_v7 }
 0x2d0   :  { %v985_v17 = vadd.f32 %v984_v16, %v2227_v32  ;;  %v986_v18 = vpop.f32.mrb[63].mxu0  ;;  %1334 = vmatmul.mubr.bf16.gmra.mrb[56].mxu1 %v1033_v6  ;;  %v1017_v20 = vmax.f32 %v981_v10, 0.0  ;;  %v1581_v32 = vcombine.high %v2267_v26, %v2267_v26 }
 0x2d1   :  { %v987_v19 = vadd.f32 %v986_v18, %v2230_v33  ;;  %v1018_v22 = vmax.f32 %v983_v15, 0.0  ;;  %v16_v33 = vstv %s2329_s10 }
 0x2d2   :  { %v1019_v21 = vmax.f32 %v985_v17, 0.0  ;;  %1452 = vmatprep.mubr.bf16.mxu0 %v1581_v32  ;;  %17 = vst [vmem:[#allocation2] sm:$0x1] %v16_v33 }
 0x2d3   :  { %v1020_v23 = vmax.f32 %v987_v19, 0.0 }
 0x2d4   :  { %v1035_v24 = vpack.c.bf16 %v1019_v21, %v1017_v20 }
 0x2d5   :  { %v1036_v25 = vpack.c.bf16 %v1020_v23, %v1018_v22 }
 0x2d7   :  { %1343 = vmatprep.mubr.bf16.mxu1 %v1036_v25 }
 0x2d8   :  { %1344 = vmatmul.mubr.bf16.gmra.mrb[60].mxu1 %v1035_v24 }
 0x2d9   :  { %v1579_v27 = vld [vmem:[#allocation2] ss:$0 sm:$0xff] }
 0x2da   :  { %1410 = vperm.xlu0 %1583, %v1579_v27  }
 0x373   :  { %v1275_v38 = vpop.f32.mrb[32].mxu1 }
 0x374   :  { %v1276_v30 = vadd.f32 %v1275_v38, %v2278_v29  ;;  %v1277_v31 = vpop.f32.mrb[33].mxu1 }
 0x375   :  { %v1278_v34 = vadd.f32 %v1277_v31, %v2281_v37  ;;  %v1279_v35 = vpop.f32.mrb[34].mxu1 }
 0x376   :  { %v1280_v36 = vadd.f32 %v1279_v35, %v2278_v29  ;;  %v1281_v39 = vpop.f32.mrb[35].mxu1  ;;  %v1354_v41 = vmax.f32 %v1276_v30, 0.0 }
 0x377   :  { %v1282_v40 = vadd.f32 %v1281_v39, %v2281_v37  ;;  %v1355_v43 = vmax.f32 %v1278_v34, 0.0 }
 0x378   :  { %v1356_v42 = vmax.f32 %v1280_v36, 0.0 }
 0x379   :  { %v1357_v9 = vmax.f32 %v1282_v40, 0.0 }
 0x37a   :  { %v1386_v44 = vpack.c.bf16 %v1356_v42, %v1354_v41 }
 0x37b   :  { %v1387_v45 = vpack.c.bf16 %v1357_v9, %v1355_v43  ;;  %v1285_v11 = vpop.f32.mrb[36].mxu1 }
 0x37c   :  { %v1286_v46 = vadd.f32 %v1285_v11, %v2278_v29  ;;  %v1287_v47 = vpop.f32.mrb[37].mxu1 }
 0x37d   :  { %v1288_v48 = vadd.f32 %v1287_v47, %v2281_v37  ;;  %v1289_v49 = vpop.f32.mrb[38].mxu1  ;;  %1420 = vmatprep.subr.bf16.mxu0 %v1387_v45 }
 0x37e   :  { %v1290_v50 = vadd.f32 %v1289_v49, %v2278_v29  ;;  %v1291_v51 = vpop.f32.mrb[39].mxu1  ;;  %1421 = vmatpush1.bf16.xpose.msra.mxu0 %v1386_v44  ;;  %v1358_v53 = vmax.f32 %v1286_v46, 0.0 }
 0x37f   :  { %v1292_v52 = vadd.f32 %v1291_v51, %v2281_v37  ;;  %v1359_v55 = vmax.f32 %v1288_v48, 0.0 }
 0x380   :  { %v1360_v54 = vmax.f32 %v1290_v50, 0.0 }
 0x381   :  { %v1361_v56 = vmax.f32 %v1292_v52, 0.0 }
 0x382   :  { %v1388_v57 = vpack.c.bf16 %v1360_v54, %v1358_v53 }
 0x383   :  { %v1389_v58 = vpack.c.bf16 %v1361_v56, %v1359_v55  ;;  %v1295_v59 = vpop.f32.mrb[40].mxu1 }
 0x384   :  { %v1296_v60 = vadd.f32 %v1295_v59, %v2278_v29  ;;  %v1297_v61 = vpop.f32.mrb[41].mxu1 }
 0x385   :  { %v1298_v62 = vadd.f32 %v1297_v61, %v2281_v37  ;;  %v1299_v63 = vpop.f32.mrb[42].mxu1  ;;  %1422 = vmatprep.subr.bf16.mxu0 %v1389_v58 }
 0x386   :  { %v1300_v0 = vadd.f32 %v1299_v63, %v2278_v29  ;;  %v1301_v1 = vpop.f32.mrb[43].mxu1  ;;  %1423 = vmatpush1.bf16.xpose.msra.mxu0 %v1388_v57  ;;  %v1362_v12 = vmax.f32 %v1296_v60, 0.0 }
 0x387   :  { %v1302_v2 = vadd.f32 %v1301_v1, %v2281_v37  ;;  %v1363_v3 = vmax.f32 %v1298_v62, 0.0 }
 0x388   :  { %v1364_v13 = vmax.f32 %v1300_v0, 0.0 }
 0x389   :  { %v1365_v4 = vmax.f32 %v1302_v2, 0.0 }
 0x38a   :  { %v1390_v5 = vpack.c.bf16 %v1364_v13, %v1362_v12 }
 0x38b   :  { %v1391_v6 = vpack.c.bf16 %v1365_v4, %v1363_v3  ;;  %v1305_v7 = vpop.f32.mrb[44].mxu1 }
 0x38c   :  { %v1306_v8 = vadd.f32 %v1305_v7, %v2278_v29  ;;  %v1307_v10 = vpop.f32.mrb[45].mxu1 }
 0x38d   :  { %v1308_v14 = vadd.f32 %v1307_v10, %v2281_v37  ;;  %v1309_v15 = vpop.f32.mrb[46].mxu1  ;;  %1424 = vmatprep.subr.bf16.mxu0 %v1391_v6 }
 0x38e   :  { %v1310_v16 = vadd.f32 %v1309_v15, %v2278_v29  ;;  %v1311_v17 = vpop.f32.mrb[47].mxu1  ;;  %1425 = vmatpush1.bf16.xpose.msra.mxu0 %v1390_v5  ;;  %v1366_v19 = vmax.f32 %v1306_v8, 0.0 }
 0x38f   :  { %v1312_v18 = vadd.f32 %v1311_v17, %v2281_v37  ;;  %v1367_v21 = vmax.f32 %v1308_v14, 0.0 }
 0x390   :  { %v1368_v20 = vmax.f32 %v1310_v16, 0.0 }
 0x391   :  { %v1369_v22 = vmax.f32 %v1312_v18, 0.0 }
 0x392   :  { %v1392_v23 = vpack.c.bf16 %v1368_v20, %v1366_v19  ;;  %v1580_v20 = vcombine.low %v2267_v26, %v2267_v26 }
 0x393   :  { %v1393_v24 = vpack.c.bf16 %v1369_v22, %v1367_v21  ;;  %v1315_v25 = vpop.f32.mrb[48].mxu1  ;;  %v1411_v21 = vpop.permute.xlu0 %1410 }
 0x394   :  { %v1316_v32 = vadd.f32 %v1315_v25, %v2278_v29  ;;  %v1317_v33 = vpop.f32.mrb[49].mxu1 }
 0x395   :  { %v1318_v27 = vadd.f32 %v1317_v33, %v2281_v37  ;;  %v1319_v28 = vpop.f32.mrb[50].mxu1  ;;  %1426 = vmatprep.subr.bf16.mxu0 %v1393_v24 }
 0x396   :  { %v1320_v38 = vadd.f32 %v1319_v28, %v2278_v29  ;;  %v1321_v30 = vpop.f32.mrb[51].mxu1  ;;  %1427 = vmatpush1.bf16.xpose.msra.mxu0 %v1392_v23  ;;  %v1370_v34 = vmax.f32 %v1316_v32, 0.0 }
 0x397   :  { %v1322_v31 = vadd.f32 %v1321_v30, %v2281_v37  ;;  %v1371_v36 = vmax.f32 %v1318_v27, 0.0 }
 0x398   :  { %v1372_v35 = vmax.f32 %v1320_v38, 0.0 }
 0x399   :  { %v1373_v39 = vmax.f32 %v1322_v31, 0.0 }
 0x39a   :  { %v1394_v40 = vpack.c.bf16 %v1372_v35, %v1370_v34 }
 0x39b   :  { %v1395_v41 = vpack.c.bf16 %v1373_v39, %v1371_v36  ;;  %v1325_v42 = vpop.f32.mrb[52].mxu1 }
 0x39c   :  { %v1326_v43 = vadd.f32 %v1325_v42, %v2278_v29  ;;  %v1327_v9 = vpop.f32.mrb[53].mxu1 }
 0x39d   :  { %v1328_v44 = vadd.f32 %v1327_v9, %v2281_v37  ;;  %v1329_v45 = vpop.f32.mrb[54].mxu1  ;;  %1428 = vmatprep.subr.bf16.mxu0 %v1395_v41 }
 0x39e   :  { %v1330_v11 = vadd.f32 %v1329_v45, %v2278_v29  ;;  %v1331_v46 = vpop.f32.mrb[55].mxu1  ;;  %1429 = vmatpush1.bf16.xpose.msra.mxu0 %v1394_v40  ;;  %v1374_v48 = vmax.f32 %v1326_v43, 0.0 }
 0x39f   :  { %v1332_v47 = vadd.f32 %v1331_v46, %v2281_v37  ;;  %v1375_v50 = vmax.f32 %v1328_v44, 0.0 }
 0x3a0   :  { %v1376_v49 = vmax.f32 %v1330_v11, 0.0 }
 0x3a1   :  { %v1377_v51 = vmax.f32 %v1332_v47, 0.0 }
 0x3a2   :  { %v1396_v52 = vpack.c.bf16 %v1376_v49, %v1374_v48 }
 0x3a3   :  { %v1397_v53 = vpack.c.bf16 %v1377_v51, %v1375_v50  ;;  %v1335_v54 = vpop.f32.mrb[56].mxu1 }
 0x3a4   :  { %v1336_v55 = vadd.f32 %v1335_v54, %v2278_v29  ;;  %v1337_v56 = vpop.f32.mrb[57].mxu1 }
 0x3a5   :  { %v1338_v57 = vadd.f32 %v1337_v56, %v2281_v37  ;;  %v1339_v58 = vpop.f32.mrb[58].mxu1  ;;  %1430 = vmatprep.subr.bf16.mxu0 %v1397_v53 }
 0x3a6   :  { %v1340_v59 = vadd.f32 %v1339_v58, %v2278_v29  ;;  %v1341_v60 = vpop.f32.mrb[59].mxu1  ;;  %1431 = vmatpush1.bf16.xpose.msra.mxu0 %v1396_v52  ;;  %v1378_v62 = vmax.f32 %v1336_v55, 0.0 }
 0x3a7   :  { %v1342_v61 = vadd.f32 %v1341_v60, %v2281_v37  ;;  %v1379_v0 = vmax.f32 %v1338_v57, 0.0 }
 0x3a8   :  { %v1380_v63 = vmax.f32 %v1340_v59, 0.0 }
 0x3a9   :  { %v1381_v1 = vmax.f32 %v1342_v61, 0.0 }
 0x3aa   :  { %v1398_v2 = vpack.c.bf16 %v1380_v63, %v1378_v62 }
 0x3ab   :  { %v1399_v12 = vpack.c.bf16 %v1381_v1, %v1379_v0  ;;  %v1345_v13 = vpop.f32.mrb[60].mxu1 }
 0x3ac   :  { %v1346_v3 = vadd.f32 %v1345_v13, %v2278_v29  ;;  %v1347_v4 = vpop.f32.mrb[61].mxu1 }
 0x3ad   :  { %v1348_v5 = vadd.f32 %v1347_v4, %v2281_v37  ;;  %v1349_v6 = vpop.f32.mrb[62].mxu1  ;;  %1432 = vmatprep.subr.bf16.mxu0 %v1399_v12 }
 0x3ae   :  { %v1350_v7 = vadd.f32 %v1349_v6, %v2278_v29  ;;  %v1351_v8 = vpop.f32.mrb[63].mxu1  ;;  %1433 = vmatpush1.bf16.xpose.msra.mxu0 %v1398_v2  ;;  %v1382_v14 = vmax.f32 %v1346_v3, 0.0 }
 0x3af   :  { %v1352_v10 = vadd.f32 %v1351_v8, %v2281_v37  ;;  %v1383_v16 = vmax.f32 %v1348_v5, 0.0 }
 0x3b0   :  { %v1384_v15 = vmax.f32 %v1350_v7, 0.0 }
 0x3b1   :  { %v1385_v17 = vmax.f32 %v1352_v10, 0.0 }
 0x3b2   :  { %v1400_v18 = vpack.c.bf16 %v1384_v15, %v1382_v14 }
 0x3b3   :  { %v1401_v19 = vpack.c.bf16 %v1385_v17, %v1383_v16 }
 0x3b5   :  { %1434 = vmatprep.subr.bf16.mxu0 %v1401_v19 }
 0x3b6   :  { %1435 = vmatpush1.bf16.xpose.msra.mxu0 %v1400_v18 }
 0x3bd   :  { %1453 = vmatmul.mubr.bf16.vlgmr.msra.gmra.mrb[64].mxu0 %v1580_v20 }
 0x490   :  { %v1454_v22 = vpop.f32.mrb[64].mxu0 }
 0x491   :  { %v1455_v23 = vadd.f32 %v1454_v22, %v1411_v21  ;;  %v1456_v29 = vpop.f32.mrb[65].mxu0 }
 0x492   :  { %v1457_v24 = vpop.f32.mrb[66].mxu0 }
 0x493   :  { %1460 = vst [vmem:[%s2331_s11] sm:$0xff] %v1455_v23  ;;  %v1458_v37 = vpop.f32.mrb[67].mxu0 }

</bundles_post_ra>
